<compile_context>
chip_gen: v7x
topology: tpu7x:2x2x1
jax: 0.10.0
libtpu: 0.0.40
codegen_flags: <defaults>
</compile_context>

<pallas_src>
import functools

import jax
import jax.numpy as jnp
from jax.experimental import pallas as pl
from jax.experimental.pallas import tpu as pltpu

TARGET_TILE_BYTES = 2 * 1024 * 1024   # ~2 MiB tiles: good on v5e/v6e/v7x
RAGGED_LANE = 512                     # lane width for the flattened fallback


def _round_up(x: int, m: int) -> int:
    return ((x + m - 1) // m) * m


def _sublane(dtype) -> int:
    return {4: 8, 2: 16, 1: 32}.get(jnp.dtype(dtype).itemsize, 8)


def _choose_block_rows(rows: int, cols: int, itemsize: int, sub: int) -> int:
    """Sublane-aligned row-block size targeting ~TARGET_TILE_BYTES per tile."""
    per_row = cols * itemsize
    block_rows = max(sub, (TARGET_TILE_BYTES // per_row) // sub * sub)
    if block_rows >= rows:
        # Whole weight fits one target tile; split into ~2 blocks so the
        # parallel grid axis has >= 2 steps (both TensorCores on v7x).
        half = (rows // 2) // sub * sub
        block_rows = half if half >= sub else sub
    return block_rows


# ---------------- Pass 1: per-tile partial sums of |w| ----------------
def _abs_sum_kernel(w_ref, partial_ref, *, rows_total, block_rows, cols,
                    mask_tail):
    x = jnp.abs(w_ref[...].astype(jnp.float32))
    if mask_tail:
        # The last row block extends past the true row count; out-of-bounds
        # rows of the VMEM tile hold unspecified data -> zero their |w|.
        limit = rows_total - pl.program_id(0) * block_rows
        ridx = jax.lax.broadcasted_iota(jnp.int32, x.shape, 0)
        x = jnp.where(ridx < limit, x, 0.0)
    # Fold rows 8-way (pure vreg adds; block_rows is a multiple of 8) ...
    s = jnp.sum(x.reshape(block_rows // 8, 8, cols), axis=0)        # (8, cols)
    # ... then fold lanes down to one 128-wide column (negligible extra work).
    acc = s[:, 0:128]
    for j in range(1, cols // 128):
        acc = acc + s[:, j * 128:(j + 1) * 128]
    partial_ref[...] = acc                                           # (8, 128)


# ---------------- Pass 2: elementwise ternary quantization ----------------
def _quant_kernel(scale_ref, w_ref, o_ref):
    alpha = scale_ref[0]               # mean(|w|)
    inv = scale_ref[1]                 # 1 / (alpha + eps), precomputed once
    w = w_ref[...].astype(jnp.float32)
    q = jnp.clip(jnp.round(w * inv), -1.0, 1.0)
    o_ref[...] = (alpha * q).astype(o_ref.dtype)


def _quantize_2d(w2d: jax.Array, true_size: int, out_dtype) -> jax.Array:
    rows, cols = w2d.shape
    itemsize = jnp.dtype(w2d.dtype).itemsize
    sub = _sublane(w2d.dtype)
    block_rows = _choose_block_rows(rows, cols, itemsize, sub)
    num_blocks = pl.cdiv(rows, block_rows)
    mask_tail = (rows % block_rows) != 0
    grid = (num_blocks,)
    cparams = pltpu.CompilerParams(
        dimension_semantics=("parallel",),
        vmem_limit_bytes=32 * 1024 * 1024)

    # Pass 1: per-tile |w| partial sums.
    partials = pl.pallas_call(
        functools.partial(_abs_sum_kernel, rows_total=rows,
                          block_rows=block_rows, cols=cols,
                          mask_tail=mask_tail),
        out_shape=jax.ShapeDtypeStruct((num_blocks * 8, 128), jnp.float32),
        grid=grid,
        in_specs=[pl.BlockSpec((block_rows, cols), lambda i: (i, 0))],
        out_specs=pl.BlockSpec((8, 128), lambda i: (i, 0)),
        compiler_params=cparams,
    )(w2d)

    # Scalar glue in XLA: alpha over the *true* element count + reciprocal.
    eps = jnp.float32(1e-8)
    alpha = jnp.sum(partials) / jnp.float32(true_size)
    scale = jnp.stack([alpha, jnp.float32(1.0) / (alpha + eps)])

    # Pass 2: elementwise quantize + rescale (tail-block writes are clamped).
    out2d = pl.pallas_call(
        _quant_kernel,
        out_shape=jax.ShapeDtypeStruct((rows, cols), out_dtype),
        grid=grid,
        in_specs=[
            pl.BlockSpec(memory_space=pltpu.SMEM),               # [alpha, inv]
            pl.BlockSpec((block_rows, cols), lambda i: (i, 0)),  # weight tile
        ],
        out_specs=pl.BlockSpec((block_rows, cols), lambda i: (i, 0)),
        compiler_params=cparams,
    )(scale, w2d)
    return out2d


def weight_quantize(weight: jax.Array) -> jax.Array:
    """Pallas implementation of WeightQuantizer.forward for any weight shape."""
    orig_shape = weight.shape
    size = weight.size
    itemsize = jnp.dtype(weight.dtype).itemsize
    sub = _sublane(weight.dtype)

    last = orig_shape[-1] if weight.ndim >= 1 else 1
    lead = size // last if last else 0

    fast = (
        weight.ndim >= 2
        and last % 128 == 0
        and lead >= sub
        and last * itemsize * sub <= TARGET_TILE_BYTES
    )

    if fast:
        # Natural lane-dense view: collapsing leading dims is free; no pad,
        # no final slice.
        w2d = weight.reshape(lead, last)
        out2d = _quantize_2d(w2d, size, weight.dtype)
        return out2d.reshape(orig_shape)

    # Ragged / tiny shapes: flatten and pad by at most sub*RAGGED_LANE - 1
    # elements (zeros add 0 to the |w| sum; alpha divides by the true size).
    chunk = sub * RAGGED_LANE
    padded = _round_up(max(size, chunk), chunk)
    flat = weight.reshape(-1)
    if padded != size:
        flat = jnp.pad(flat, (0, padded - size))
    w2d = flat.reshape(padded // RAGGED_LANE, RAGGED_LANE)
    out2d = _quantize_2d(w2d, size, weight.dtype)
    return out2d.reshape(-1)[:size].reshape(orig_shape)


def _reference(weight):
    alpha = jnp.mean(jnp.abs(weight))
    eps = 1e-8
    nw = weight / (alpha + eps)
    q = jnp.clip(jnp.round(nw), -1.0, 1.0)
    return alpha * q


if __name__ == "__main__":
    key = jax.random.PRNGKey(0)
    k1, k2, k3 = jax.random.split(key, 3)

    # Linear-layer-like weight [out=32, in=128]: fast path, no pad/slice.
    w_lin = jax.random.normal(k1, (32, 128), dtype=jnp.float32) * 0.5
    out_lin = jax.block_until_ready(weight_quantize(w_lin))
    ref_lin = _reference(w_lin)
    assert out_lin.shape == ref_lin.shape and out_lin.dtype == ref_lin.dtype
    assert jnp.allclose(out_lin, ref_lin, atol=1e-5, rtol=1e-5), "linear mismatch"

    # Row count not a multiple of the block: exercises the masked tail block.
    w_odd = jax.random.normal(k2, (20, 256), dtype=jnp.float32) * 0.3
    out_odd = jax.block_until_ready(weight_quantize(w_odd))
    ref_odd = _reference(w_odd)
    assert out_odd.shape == ref_odd.shape and out_odd.dtype == ref_odd.dtype
    assert jnp.allclose(out_odd, ref_odd, atol=1e-5, rtol=1e-5), "masked-tail mismatch"

    # Conv-like weight (OIHW): ragged last dim -> flatten fallback path.
    w_conv = jax.random.normal(k3, (16, 48, 3, 3), dtype=jnp.float32) * 0.1
    out_conv = jax.block_until_ready(weight_quantize(w_conv))
    ref_conv = _reference(w_conv)
    assert out_conv.shape == ref_conv.shape and out_conv.dtype == ref_conv.dtype
    assert jnp.allclose(out_conv, ref_conv, atol=1e-5, rtol=1e-5), "conv mismatch"

    print("KERNEL_OK")
</pallas_src>

<mosaic_0001>
module attributes {stable_mosaic.version = 11 : i64} {
  func.func @_abs_sum_kernel(%arg0: i32, %arg1: memref<16x128xf32, #tpu.memory_space<vmem>>, %arg2: memref<8x128xf32, #tpu.memory_space<vmem>>) attributes {dimension_semantics = [#tpu.dimension_semantics<parallel>], iteration_bounds = array<i64: 2>, scalar_prefetch = 0 : i64, scratch_operands = 0 : i64, tpu.core_type = #tpu.core_type<tc>, window_params = [{transform_indices = @transform_0, window_bounds = array<i64: 16, 128>}, {transform_indices = @transform_1, window_bounds = array<i64: 8, 128>}]} {
    %c0 = arith.constant 0 : index
    %c0_0 = arith.constant 0 : index
    %0 = vector.load %arg1[%c0, %c0_0] : memref<16x128xf32, #tpu.memory_space<vmem>>, vector<16x128xf32>
    %1 = math.absf %0 : vector<16x128xf32>
    %2 = vector.shape_cast %1 : vector<16x128xf32> to vector<2x8x128xf32>
    %cst = arith.constant dense<0.000000e+00> : vector<8x128xf32>
    %3 = vector.multi_reduction <add>, %2, %cst [0] : vector<2x8x128xf32> to vector<8x128xf32>
    %c0_1 = arith.constant 0 : index
    %c0_2 = arith.constant 0 : index
    %4 = vector.load %arg2[%c0_1, %c0_2] : memref<8x128xf32, #tpu.memory_space<vmem>>, vector<8x128xf32>
    tpu.vector_store %arg2[%c0_1, %c0_2], %3 {strides = array<i32>} : memref<8x128xf32, #tpu.memory_space<vmem>>, vector<8x128xf32>,
    return
  }
  func.func @transform_0(%arg0: i32) -> (i32, i32) {
    %c0_i32 = arith.constant 0 : i32
    %c0_i32_0 = arith.constant 0 : i32
    return %arg0, %c0_i32 : i32, i32
  }
  func.func @transform_1(%arg0: i32) -> (i32, i32) {
    %c0_i32 = arith.constant 0 : i32
    %c0_i32_0 = arith.constant 0 : i32
    return %arg0, %c0_i32 : i32, i32
  }
}

</mosaic_0001>

<bundles_post_ra>
// kernel: tpu_custom_call.1
= control target key start
LH: loop header
LB: loop body
LE: loop exit
PB: predicated region body
PF: predicated region fallthrough
CT: control target
= control target key end

     0   :  { %6 = vsyncpa [#allocation3], 0  ;;  %s561_s0 = inlined_call_operand.hbm [shape: f32[32,128], index: 0, kind: input, shape index: {}]   ;;  %s562_s1 = inlined_call_operand.hbm [shape: f32[16,128], index: 1, kind: output, shape index: {}]  }
   0x1   :  { %8 = vsyncpa [#allocation3 + $0x1], 0 }
   0x2   :  { %9 = vsyncpa [#allocation4], 0 }
   0x3   :  { %11 = vsyncpa [#allocation4 + $0x1], 0  ;;  %s400_s6 = smov 0   ;;  %s402_s7 = smov 0  }
   0x4   :  { %s404_s8 = smov 0   ;;  %s406_s9 = smov 0  }
   0x5 LB: > { %s421_s10 = sadd.s32 4294967295, %s384_s9   ;;  %s226_s11 = sadd.s32 4294967294, %s384_s9   ;;  %s384_s9 = sphi %s406_s9, %s575_s9   ;;  %s380_s8 = sphi %s404_s8, %s574_s8   ;;  %s376_s7 = sphi %s402_s7, %s573_s7   ;;  %s372_s6 = sphi %s400_s6, %s572_s6  }
   0x6   : > { %s425_s12 = sadd.s32 1, %s384_s9   ;;  %s24_s13 = sadd.s32 1, %s380_s8 }
   0x7   : > { %s21_s14 = ssub.s32 %s384_s9, %s425_s12  ;;  %p31_p0 = scmp.ne.s32.totalorder %s380_s8, %s376_s7 }
   0x8   : > { %p22_p1 = scmp.eq.s32.totalorder %s21_s14, 0  ;;  %p32_p2 = scmp.eq.s32.totalorder %s384_s9, 0 }
   0x9   : > { %p37_p3 = scmp.ne.s32.totalorder %s376_s7, %s372_s6  ;;  %p38_p4 = scmp.eq.s32.totalorder %s421_s10, 0 }
   0xa   : > { %s437_s15 = scalar_select %p22_p1, %s380_s8, %s24_s13  }
   0xb   : > { %p439_p5 = por %p32_p2, %p31_p0  ;;  %p443_p6 = por %p38_p4, %p37_p3 }
   0xc   : > { %p61_p7 = scmp.eq.s32.totalorder %s421_s10, 1  ;;  %p67_p8 = scmp.eq.s32.totalorder %s226_s11, 1 }
   0xd   : > { %p252_p10 = scmp.lt.s32.totalorder %s384_s9, 2  ;;  %s87_s20 = sand.u32 1, %s380_s8  }
   0xe   : > { %p450_p11 = por %p61_p7, %p31_p0  ;;  %p454_p12 = por %p67_p8, %p37_p3 }
   0xf   : > { %s239_s21 = sshll.u32 %s384_s9, 8  ;;  %s229_s22 = sshll.u32 %s87_s20, 4 }
  0x10   : > { %s566_s18 = scalar_select %p450_p11, 1, 0 }
  0x11   : > { %s567_s19 = scalar_select %p454_p12, 1, 0 }
  0x12   : > { %s463_s25 = scalar_lea.hbm %s561_s0, %s239_s21  ;;  %s91_s26 = scalar_lea.vmem [#allocation2], %s229_s22 }
  0x13   : > { %s98_s27 = sshll.u32 %s91_s26, 4  ;;  %p467_p13 = pnand %p252_p10, %p439_p5  ;;  %s471_s27 = int_to_ptr.vmem [resolvable:$true] %s98_s27 }
  0x14   : > { %s473_s29 = scalar_lea.sflag [#allocation3], %s87_s20  ;;  %s288_s30 = scalar_lea.hbm %s463_s25, 256 }
  0x15   : > { %p289_p0 = scmp.ne.s32.totalorder %s463_s25, %s288_s30  ;;  %p290_p1 = pneg %p467_p13 }
  0x16   : > { %s293_s4 = scalar_lea.hbm %s561_s0, 512  ;;  %p294_p4 = scmp.lt.u32.totalorder %s463_s25, %s561_s0 }
  0x17   : > { %p291_p2 = pnand %p290_p1, %p289_p0  ;;  %p295_p5 = scmp.lt.u32.totalorder %s293_s4, %s288_s30 }
  0x18   : > { %p297_p8 = scmp.lt.u32.totalorder %s288_s30, %s463_s25 }
  0x19   : > { %p292_p3 = pneg %p291_p2  ;;  %p296_p7 = por %p295_p5, %p294_p4 }
  0x1b   : > { %p298_p10 = por %p297_p8, %p296_p7 }
  0x1d   : > { %p299_p9 = pnand %p298_p10, %p292_p3 }
  0x1f   : > { %302 = shalt.err (!%p299_p9)
}
  0x20   : > { %s303_s13 = scalar_lea.vmem %s471_s27, 256  ;;  %s386_s14 = smov [#allocation2]  }
  0x21   : > { %p304_p0 = scmp.ne.s32.totalorder %s471_s27, %s303_s13  ;;  %s308_s16 = sshll.u32 %s386_s14, 4  ;;  %s309_s16 = int_to_ptr.vmem [resolvable:$false] %s308_s16 }
  0x22   : > { %s310_s20 = scalar_lea.vmem %s309_s16, 512  ;;  %p311_p11 = scmp.lt.s32.totalorder %s471_s27, %s309_s16 }
  0x23   : > { %p306_p2 = pnand %p304_p0, %p290_p1  ;;  %p312_p4 = scmp.lt.s32.totalorder %s310_s20, %s303_s13 }
  0x25   : > { %p307_p12 = pneg %p306_p2  ;;  %p313_p5 = por %p312_p4, %p311_p11 }
  0x27   : > { %p314_p7 = pnand %p313_p5, %p307_p12 }
  0x29   : > { %317 = shalt.err (!%p314_p7)
}
  0x2a   : > { %s387_s21 = smov 128   ;;  %s388_s22 = smov 8  }
  0x2b   : > { %247 = dma.hbm_to_vmem [thread:$0]  (!%p467_p13), %s463_s25, 256, %s471_s27, %s473_s29, %s387_s21, %s387_s21, %s388_s22  }
  0x2c   : > { %p232_p9 = scmp.ge.s32.totalorder %s384_s9, 1  ;;  %p106_p1 = scmp.lt.s32.totalorder %s384_s9, 3 }
  0x2e   : > { %p107_p3 = pnand %p232_p9, %p106_p1 }
  0x2f   : > { %s504_s23 = sand.u32 (!%p107_p3), 1, %s376_s7  }
  0x30   : > { %110 = sbr.rel (%p107_p3) target bundleno = 82 (0x52), region = 24  ;;  %s233_s24 = sshll.u32 (!%p107_p3), %s504_s23, 4 }
  0x31   : > { %s113_s26 = scalar_lea.sflag (!%p107_p3), [#allocation3], %s504_s23  ;;  %s116_s30 = scalar_lea.vmem (!%p107_p3), [#allocation2], %s233_s24 }
  0x37   : > { %363 = dma.done.wait (%p443_p6), %s113_s26, 256  }
  0x38   : > { %365 = vsyncadd (%p443_p6), %s113_s26, 4294967040  ;;  %s234_s25 = sshll.u32 %s504_s23, 3  ;;  %v136_v0 = vld [vmem:[%s116_s30] sm:$0xff]  ;;  %v137_v1 = vld [vmem:[%s116_s30 + $0x8] sm:$0xff]  ;;  %s236_s29 = sshll.u32 %s421_s10, 7 }
  0x39   : > { %s134_s27 = scalar_lea.vmem [#allocation5], %s234_s25  ;;  %v138_v2 = vand.u32 2147483647, %v136_v0  ;;  %v139_v3 = vand.u32 2147483647, %v137_v1  ;;  %s519_s17 = scalar_lea.hbm %s562_s1, %s236_s29 }
  0x3a   : > { %s156_s28 = sshll.u32 %s134_s27, 4  ;;  %s143_s4 = scalar_lea.sflag [#allocation4], %s504_s23  ;;  %s514_s28 = int_to_ptr.vmem [resolvable:$true] %s156_s28 }
  0x3b   : > { %v140_v4 = vadd.f32 %v139_v3, %v138_v2  ;;  %s318_s5 = scalar_lea.vmem %s514_s28, 128  ;;  %p569_p11 = scmp.ne.s32.totalorder %s566_s18, 0 }
  0x3c   : > { %p319_p6 = scmp.ne.s32.totalorder %s514_s28, %s318_s5  ;;  %s389_s10 = smov [#allocation5]  }
  0x3d   : > { %141 = vst [vmem:[%s134_s27] sm:$0xff] %v140_v4  ;;  %s322_s11 = sshll.u32 %s389_s10, 4  ;;  %s323_s11 = int_to_ptr.vmem [resolvable:$false] %s322_s11 }
  0x3e   : > { %p320_p12 = pnand %p319_p6, %p569_p11  ;;  %s324_s13 = scalar_lea.vmem %s323_s11, 256 }
  0x3f   : > { %p325_p8 = scmp.lt.s32.totalorder %s514_s28, %s323_s11  ;;  %p326_p10 = scmp.lt.s32.totalorder %s324_s13, %s318_s5 }
  0x40   : > { %p321_p13 = pneg %p320_p12 }
  0x41   : > { %p327_p0 = por %p326_p10, %p325_p8 }
  0x43   : > { %p328_p2 = pnand %p327_p0, %p321_p13 }
  0x45   : > { %331 = shalt.err (!%p328_p2)
}
  0x46   : > { %s332_s14 = scalar_lea.hbm %s519_s17, 128  ;;  %s336_s21 = scalar_lea.hbm %s562_s1, 256 }
  0x47   : > { %p333_p4 = scmp.ne.s32.totalorder %s519_s17, %s332_s14  ;;  %p337_p9 = scmp.lt.u32.totalorder %s519_s17, %s562_s1 }
  0x48   : > { %p338_p1 = scmp.lt.u32.totalorder %s336_s21, %s332_s14  ;;  %p340_p6 = scmp.lt.u32.totalorder %s332_s14, %s519_s17 }
  0x49   : > { %p334_p5 = pnand %p333_p4, %p569_p11 }
  0x4a   : > { %p339_p3 = por %p338_p1, %p337_p9 }
  0x4b   : > { %p335_p7 = pneg %p334_p5 }
  0x4c   : > { %p341_p12 = por %p340_p6, %p339_p3 }
  0x4e   : > { %p342_p13 = pnand %p341_p12, %p335_p7 }
  0x50   : > { %345 = shalt.err (!%p342_p13)
}
  0x51   : > { %242 = dma.vmem_to_hbm [thread:$0]  (%p569_p11), %s514_s28, 128, %s519_s17, %s143_s4  }
  0x52 PF: > { %s168_s24 = sand.u32 1, %s372_s6   ;;  %p570_p8 = scmp.ne.s32.totalorder %s567_s19, 0 }
  0x53   : > { %p571_p10 = scmp.ge.s32.totalorder %s384_s9, 2  ;;  %s169_s26 = scalar_lea.sflag [#allocation4], %s168_s24 }
  0x55   : > { %p249_p0 = pnand %p571_p10, %p570_p8 }
  0x57   : > { %367 = dma.done.wait (!%p249_p0), %s169_s26, 128  }
  0x58   : > { %369 = vsyncadd (!%p249_p0), %s169_s26, 4294967168  ;;  %p14_p2 = scmp.ge.s32.totalorder %s425_s12, 4   ;;  %s572_s6 = smov %s376_s7 }
  0x59   : > { %s573_s7 = smov %s380_s8  ;;  %s574_s8 = smov %s437_s15 }
  0x5a   : > { %s575_s9 = smov %s425_s12  ;;  %16 = sbr.rel (!%p14_p2) target bundleno = 5 (0x5), region = 69 }
  0x61   :  { %174 = vsyncpa [#allocation3], 1 }
  0x62   :  { %176 = vsyncpa [#allocation3 + $0x1], 1 }
  0x63   :  { %177 = vsyncpa [#allocation4], 1 }
  0x64   :  { %179 = vsyncpa [#allocation4 + $0x1], 1 }

</bundles_post_ra>
